<compile_context>
chip_gen: v7x
topology: tpu7x:2x2x1
jax: 0.10.0
libtpu: 0.0.40
codegen_flags: <defaults>
</compile_context>

<pallas_src>
import jax
import jax.numpy as jnp
from jax import lax
from jax.experimental import pallas as pl
from jax.experimental.pallas import tpu as pltpu

BN_EPS = 1e-5   # nn.BatchNorm2d default eps
GN_EPS = 1e-5   # BCNorm eps (second torch.batch_norm)


def _choose_group_block(G, Cg, HW, budget_bytes):
    # per (n, g) block: input + output, double-buffered, f32
    per_group = 2 * 2 * Cg * HW * 4
    gb = max(1, min(G, budget_bytes // max(per_group, 1)))
    while G % gb:
        gb -= 1
    return gb


def bcnorm_pallas(x, gamma_bn, beta_bn, w_g, b_g, num_groups,
                  *, vmem_budget_bytes=8 * 1024 * 1024):
    N, C, H, W = x.shape
    G = num_groups
    Cg = C // G
    HW = H * W

    x4 = x.reshape(N, G, Cg, HW).astype(jnp.float32)
    gam = gamma_bn.reshape(G, Cg, 1).astype(jnp.float32)
    bet = beta_bn.reshape(G, Cg, 1).astype(jnp.float32)
    w3 = w_g.reshape(G, 1, 1).astype(jnp.float32)
    b3 = b_g.reshape(G, 1, 1).astype(jnp.float32)

    gb = _choose_group_block(G, Cg, HW, vmem_budget_bytes)
    n_gblk = G // gb

    inv_cnt_bn = 1.0 / float(N * HW)      # BN stats count per channel
    inv_cnt_g = 1.0 / float(Cg * HW)      # stage-2 count per (sample, group)

    # ------------------------------------------------------------------
    # Kernel 1: per-channel BatchNorm2d stats (training mode, biased var),
    # folded into scale/shift:  scale = gamma * rsqrt(var + eps)
    #                           shift = beta - mean * scale
    # Grid: (group-blocks [parallel], N [arbitrary / reduction]).
    # ------------------------------------------------------------------
    def bn_stats_kernel(x_ref, gam_ref, bet_ref,
                        scale_ref, shift_ref, s_ref, s2_ref):
        n = pl.program_id(1)

        @pl.when(n == 0)
        def _init():
            s_ref[...] = jnp.zeros_like(s_ref)
            s2_ref[...] = jnp.zeros_like(s2_ref)

        xb = x_ref[...]                                      # (1, gb, Cg, HW)
        s_ref[...] += jnp.sum(xb, axis=3, keepdims=True)[0]          # (gb,Cg,1)
        s2_ref[...] += jnp.sum(xb * xb, axis=3, keepdims=True)[0]

        @pl.when(n == pl.num_programs(1) - 1)
        def _finalize():
            mean = s_ref[...] * inv_cnt_bn
            var = s2_ref[...] * inv_cnt_bn - mean * mean
            scale = gam_ref[...] * lax.rsqrt(var + BN_EPS)
            scale_ref[...] = scale
            shift_ref[...] = bet_ref[...] - mean * scale

    scale_c, shift_c = pl.pallas_call(
        bn_stats_kernel,
        out_shape=(jax.ShapeDtypeStruct((G, Cg, 1), jnp.float32),
                   jax.ShapeDtypeStruct((G, Cg, 1), jnp.float32)),
        grid=(n_gblk, N),
        in_specs=[pl.BlockSpec((1, gb, Cg, HW), lambda g, n: (n, g, 0, 0)),
                  pl.BlockSpec((gb, Cg, 1), lambda g, n: (g, 0, 0)),
                  pl.BlockSpec((gb, Cg, 1), lambda g, n: (g, 0, 0))],
        out_specs=(pl.BlockSpec((gb, Cg, 1), lambda g, n: (g, 0, 0)),
                   pl.BlockSpec((gb, Cg, 1), lambda g, n: (g, 0, 0))),
        scratch_shapes=[pltpu.VMEM((gb, Cg, 1), jnp.float32),
                        pltpu.VMEM((gb, Cg, 1), jnp.float32)],
        compiler_params=pltpu.CompilerParams(
            dimension_semantics=("parallel", "arbitrary")),
    )(x4, gam, bet)

    # ------------------------------------------------------------------
    # Kernel 2: apply.  y = x*scale + shift (stage-1 folded), then
    # per-(sample, group) normalization (stage-2, single-pass sums) and the
    # per-group BCNorm affine (stage-3), fused into one mul+add.
    # Grid: (N [parallel], group-blocks [parallel]).
    # ------------------------------------------------------------------
    def apply_kernel(x_ref, scale_ref, shift_ref, w_ref, b_ref, o_ref):
        xb = x_ref[...]                                      # (1, gb, Cg, HW)
        y = xb * scale_ref[...] + shift_ref[...]
        mg = jnp.sum(y, axis=(2, 3), keepdims=True) * inv_cnt_g       # (1,gb,1,1)
        vg = jnp.sum(y * y, axis=(2, 3), keepdims=True) * inv_cnt_g - mg * mg
        a = w_ref[...] * lax.rsqrt(vg + GN_EPS)               # (1, gb, 1, 1)
        c = b_ref[...] - mg * a
        o_ref[...] = y * a + c

    out4 = pl.pallas_call(
        apply_kernel,
        out_shape=jax.ShapeDtypeStruct((N, G, Cg, HW), jnp.float32),
        grid=(N, n_gblk),
        in_specs=[pl.BlockSpec((1, gb, Cg, HW), lambda n, g: (n, g, 0, 0)),
                  pl.BlockSpec((gb, Cg, 1), lambda n, g: (g, 0, 0)),
                  pl.BlockSpec((gb, Cg, 1), lambda n, g: (g, 0, 0)),
                  pl.BlockSpec((gb, 1, 1), lambda n, g: (g, 0, 0)),
                  pl.BlockSpec((gb, 1, 1), lambda n, g: (g, 0, 0))],
        out_specs=pl.BlockSpec((1, gb, Cg, HW), lambda n, g: (n, g, 0, 0)),
        compiler_params=pltpu.CompilerParams(
            dimension_semantics=("parallel", "parallel")),
    )(x4, scale_c, shift_c, w3, b3)

    return out4.reshape(N, C, H, W)


def bcnorm_ref(x, gamma_bn, beta_bn, w_g, b_g, G):
    # Pure-JAX reference replicating the PyTorch forward (training mode).
    N, C, H, W = x.shape
    mu = jnp.mean(x, axis=(0, 2, 3), keepdims=True)
    var = jnp.mean((x - mu) ** 2, axis=(0, 2, 3), keepdims=True)
    y = (x - mu) / jnp.sqrt(var + BN_EPS)
    y = y * gamma_bn.reshape(1, C, 1, 1) + beta_bn.reshape(1, C, 1, 1)
    z = y.reshape(1, N * G, -1)
    m = jnp.mean(z, axis=(0, 2), keepdims=True)
    v = jnp.mean((z - m) ** 2, axis=(0, 2), keepdims=True)
    z = (z - m) / jnp.sqrt(v + GN_EPS)
    z = z.reshape(N, G, -1)
    z = w_g.reshape(1, G, 1) * z + b_g.reshape(1, G, 1)
    return z.reshape(N, C, H, W)


if __name__ == "__main__":
    N, C, H, W, G = 2, 4, 16, 16, 2

    key = jax.random.PRNGKey(0)
    kx, kg, kb, kw, kbb = jax.random.split(key, 5)
    x = jax.random.normal(kx, (N, C, H, W), jnp.float32)

    # Parameter shapes per the module __init__:
    #   BatchNorm2d: weight (C,), bias (C,)
    #   BCNorm:      weight (1, G, 1), bias (1, G, 1)
    gamma_bn = 1.0 + 0.1 * jax.random.normal(kg, (C,), jnp.float32)
    beta_bn = 0.1 * jax.random.normal(kb, (C,), jnp.float32)
    w_g = 1.0 + 0.1 * jax.random.normal(kw, (1, G, 1), jnp.float32)
    b_g = 0.1 * jax.random.normal(kbb, (1, G, 1), jnp.float32)

    out = bcnorm_pallas(x, gamma_bn, beta_bn, w_g, b_g, G)
    out = jax.block_until_ready(out)

    ref = bcnorm_ref(x, gamma_bn, beta_bn, w_g, b_g, G)
    err = float(jnp.max(jnp.abs(out - ref)))
    assert jnp.allclose(out, ref, atol=1e-4, rtol=1e-4), f"max abs err {err}"
    print("KERNEL_OK")
</pallas_src>

<mosaic_0001>
module attributes {stable_mosaic.version = 11 : i64} {
  func.func @bn_stats_kernel(%arg0: i32, %arg1: i32, %arg2: memref<1x2x2x256xf32, #tpu.memory_space<vmem>>, %arg3: memref<2x2x1xf32, #tpu.memory_space<vmem>>, %arg4: memref<2x2x1xf32, #tpu.memory_space<vmem>>, %arg5: memref<2x2x1xf32, #tpu.memory_space<vmem>>, %arg6: memref<2x2x1xf32, #tpu.memory_space<vmem>>, %arg7: memref<2x2x1xf32, #tpu.memory_space<vmem>>, %arg8: memref<2x2x1xf32, #tpu.memory_space<vmem>>) attributes {dimension_semantics = [#tpu.dimension_semantics<parallel>, #tpu.dimension_semantics<arbitrary>], iteration_bounds = array<i64: 1, 2>, scalar_prefetch = 0 : i64, scratch_operands = 2 : i64, tpu.core_type = #tpu.core_type<tc>, window_params = [{transform_indices = @transform_0, window_bounds = array<i64: 1, 2, 2, 256>}, {transform_indices = @transform_1, window_bounds = array<i64: 2, 2, 1>}, {transform_indices = @transform_2, window_bounds = array<i64: 2, 2, 1>}, {transform_indices = @transform_3, window_bounds = array<i64: 2, 2, 1>}, {transform_indices = @transform_4, window_bounds = array<i64: 2, 2, 1>}]} {
    %c0_i32 = arith.constant 0 : i32
    %0 = arith.cmpi eq, %arg1, %c0_i32 : i32
    %1 = arith.extui %0 : i1 to i32
    %c0_i32_0 = arith.constant 0 : i32
    %2 = arith.cmpi ne, %1, %c0_i32_0 : i32
    scf.if %2 {
      %cst_18 = arith.constant 0.000000e+00 : f32
      %20 = vector.broadcast %cst_18 : f32 to vector<2x2x1xf32>
      %c0_19 = arith.constant 0 : index
      %c0_20 = arith.constant 0 : index
      %c0_21 = arith.constant 0 : index
      %21 = vector.load %arg7[%c0_19, %c0_20, %c0_21] : memref<2x2x1xf32, #tpu.memory_space<vmem>>, vector<2x2x1xf32>
      tpu.vector_store %arg7[%c0_19, %c0_20, %c0_21], %20 {strides = array<i32>} : memref<2x2x1xf32, #tpu.memory_space<vmem>>, vector<2x2x1xf32>,
      %cst_22 = arith.constant 0.000000e+00 : f32
      %22 = vector.broadcast %cst_22 : f32 to vector<2x2x1xf32>
      %c0_23 = arith.constant 0 : index
      %c0_24 = arith.constant 0 : index
      %c0_25 = arith.constant 0 : index
      %23 = vector.load %arg8[%c0_23, %c0_24, %c0_25] : memref<2x2x1xf32, #tpu.memory_space<vmem>>, vector<2x2x1xf32>
      tpu.vector_store %arg8[%c0_23, %c0_24, %c0_25], %22 {strides = array<i32>} : memref<2x2x1xf32, #tpu.memory_space<vmem>>, vector<2x2x1xf32>,
    } else {
    }
    %c0 = arith.constant 0 : index
    %c0_1 = arith.constant 0 : index
    %c0_2 = arith.constant 0 : index
    %c0_3 = arith.constant 0 : index
    %3 = vector.load %arg2[%c0, %c0_1, %c0_2, %c0_3] : memref<1x2x2x256xf32, #tpu.memory_space<vmem>>, vector<1x2x2x256xf32>
    %c0_4 = arith.constant 0 : index
    %c0_5 = arith.constant 0 : index
    %c0_6 = arith.constant 0 : index
    %4 = vector.load %arg7[%c0_4, %c0_5, %c0_6] : memref<2x2x1xf32, #tpu.memory_space<vmem>>, vector<2x2x1xf32>
    %cst = arith.constant dense<0.000000e+00> : vector<1x2x2xf32>
    %5 = vector.multi_reduction <add>, %3, %cst [3] : vector<1x2x2x256xf32> to vector<1x2x2xf32>
    %6 = vector.shape_cast %5 : vector<1x2x2xf32> to vector<1x2x2x1xf32>
    %7 = vector.shape_cast %6 : vector<1x2x2x1xf32> to vector<2x2x1xf32>
    %8 = arith.addf %4, %7 : vector<2x2x1xf32>
    %c0_7 = arith.constant 0 : index
    %c0_8 = arith.constant 0 : index
    %c0_9 = arith.constant 0 : index
    %9 = vector.load %arg7[%c0_7, %c0_8, %c0_9] : memref<2x2x1xf32, #tpu.memory_space<vmem>>, vector<2x2x1xf32>
    tpu.vector_store %arg7[%c0_7, %c0_8, %c0_9], %8 {strides = array<i32>} : memref<2x2x1xf32, #tpu.memory_space<vmem>>, vector<2x2x1xf32>,
    %c0_10 = arith.constant 0 : index
    %c0_11 = arith.constant 0 : index
    %c0_12 = arith.constant 0 : index
    %10 = vector.load %arg8[%c0_10, %c0_11, %c0_12] : memref<2x2x1xf32, #tpu.memory_space<vmem>>, vector<2x2x1xf32>
    %11 = arith.mulf %3, %3 : vector<1x2x2x256xf32>
    %cst_13 = arith.constant dense<0.000000e+00> : vector<1x2x2xf32>
    %12 = vector.multi_reduction <add>, %11, %cst_13 [3] : vector<1x2x2x256xf32> to vector<1x2x2xf32>
    %13 = vector.shape_cast %12 : vector<1x2x2xf32> to vector<1x2x2x1xf32>
    %14 = vector.shape_cast %13 : vector<1x2x2x1xf32> to vector<2x2x1xf32>
    %15 = arith.addf %10, %14 : vector<2x2x1xf32>
    %c0_14 = arith.constant 0 : index
    %c0_15 = arith.constant 0 : index
    %c0_16 = arith.constant 0 : index
    %16 = vector.load %arg8[%c0_14, %c0_15, %c0_16] : memref<2x2x1xf32, #tpu.memory_space<vmem>>, vector<2x2x1xf32>
    tpu.vector_store %arg8[%c0_14, %c0_15, %c0_16], %15 {strides = array<i32>} : memref<2x2x1xf32, #tpu.memory_space<vmem>>, vector<2x2x1xf32>,
    %c1_i32 = arith.constant 1 : i32
    %17 = arith.cmpi eq, %arg1, %c1_i32 : i32
    %18 = arith.extui %17 : i1 to i32
    %c0_i32_17 = arith.constant 0 : i32
    %19 = arith.cmpi ne, %18, %c0_i32_17 : i32
    scf.if %19 {
      %c0_18 = arith.constant 0 : index
      %c0_19 = arith.constant 0 : index
      %c0_20 = arith.constant 0 : index
      %20 = vector.load %arg7[%c0_18, %c0_19, %c0_20] : memref<2x2x1xf32, #tpu.memory_space<vmem>>, vector<2x2x1xf32>
      %cst_21 = arith.constant 0.001953125 : f32
      %21 = vector.broadcast %cst_21 : f32 to vector<2x2x1xf32>
      %22 = arith.mulf %20, %21 : vector<2x2x1xf32>
      %c0_22 = arith.constant 0 : index
      %c0_23 = arith.constant 0 : index
      %c0_24 = arith.constant 0 : index
      %23 = vector.load %arg8[%c0_22, %c0_23, %c0_24] : memref<2x2x1xf32, #tpu.memory_space<vmem>>, vector<2x2x1xf32>
      %cst_25 = arith.constant 0.001953125 : f32
      %24 = vector.broadcast %cst_25 : f32 to vector<2x2x1xf32>
      %25 = arith.mulf %23, %24 : vector<2x2x1xf32>
      %26 = arith.mulf %22, %22 : vector<2x2x1xf32>
      %27 = arith.subf %25, %26 : vector<2x2x1xf32>
      %c0_26 = arith.constant 0 : index
      %c0_27 = arith.constant 0 : index
      %c0_28 = arith.constant 0 : index
      %28 = vector.load %arg3[%c0_26, %c0_27, %c0_28] : memref<2x2x1xf32, #tpu.memory_space<vmem>>, vector<2x2x1xf32>
      %cst_29 = arith.constant 9.99999974E-6 : f32
      %29 = vector.broadcast %cst_29 : f32 to vector<2x2x1xf32>
      %30 = arith.addf %27, %29 : vector<2x2x1xf32>
      %31 = math.rsqrt %30 : vector<2x2x1xf32>
      %32 = arith.mulf %28, %31 : vector<2x2x1xf32>
      %c0_30 = arith.constant 0 : index
      %c0_31 = arith.constant 0 : index
      %c0_32 = arith.constant 0 : index
      %33 = vector.load %arg5[%c0_30, %c0_31, %c0_32] : memref<2x2x1xf32, #tpu.memory_space<vmem>>, vector<2x2x1xf32>
      tpu.vector_store %arg5[%c0_30, %c0_31, %c0_32], %32 {strides = array<i32>} : memref<2x2x1xf32, #tpu.memory_space<vmem>>, vector<2x2x1xf32>,
      %c0_33 = arith.constant 0 : index
      %c0_34 = arith.constant 0 : index
      %c0_35 = arith.constant 0 : index
      %34 = vector.load %arg4[%c0_33, %c0_34, %c0_35] : memref<2x2x1xf32, #tpu.memory_space<vmem>>, vector<2x2x1xf32>
      %35 = arith.mulf %22, %32 : vector<2x2x1xf32>
      %36 = arith.subf %34, %35 : vector<2x2x1xf32>
      %c0_36 = arith.constant 0 : index
      %c0_37 = arith.constant 0 : index
      %c0_38 = arith.constant 0 : index
      %37 = vector.load %arg6[%c0_36, %c0_37, %c0_38] : memref<2x2x1xf32, #tpu.memory_space<vmem>>, vector<2x2x1xf32>
      tpu.vector_store %arg6[%c0_36, %c0_37, %c0_38], %36 {strides = array<i32>} : memref<2x2x1xf32, #tpu.memory_space<vmem>>, vector<2x2x1xf32>,
    } else {
    }
    return
  }
  func.func @transform_0(%arg0: i32, %arg1: i32) -> (i32, i32, i32, i32) {
    %c0_i32 = arith.constant 0 : i32
    %c0_i32_0 = arith.constant 0 : i32
    %c0_i32_1 = arith.constant 0 : i32
    return %arg1, %arg0, %c0_i32, %c0_i32_0 : i32, i32, i32, i32
  }
  func.func @transform_1(%arg0: i32, %arg1: i32) -> (i32, i32, i32) {
    %c0_i32 = arith.constant 0 : i32
    %c0_i32_0 = arith.constant 0 : i32
    %c0_i32_1 = arith.constant 0 : i32
    return %arg0, %c0_i32, %c0_i32_0 : i32, i32, i32
  }
  func.func @transform_2(%arg0: i32, %arg1: i32) -> (i32, i32, i32) {
    %c0_i32 = arith.constant 0 : i32
    %c0_i32_0 = arith.constant 0 : i32
    %c0_i32_1 = arith.constant 0 : i32
    return %arg0, %c0_i32, %c0_i32_0 : i32, i32, i32
  }
  func.func @transform_3(%arg0: i32, %arg1: i32) -> (i32, i32, i32) {
    %c0_i32 = arith.constant 0 : i32
    %c0_i32_0 = arith.constant 0 : i32
    %c0_i32_1 = arith.constant 0 : i32
    return %arg0, %c0_i32, %c0_i32_0 : i32, i32, i32
  }
  func.func @transform_4(%arg0: i32, %arg1: i32) -> (i32, i32, i32) {
    %c0_i32 = arith.constant 0 : i32
    %c0_i32_0 = arith.constant 0 : i32
    %c0_i32_1 = arith.constant 0 : i32
    return %arg0, %c0_i32, %c0_i32_0 : i32, i32, i32
  }
}

</mosaic_0001>

<bundles_post_ra>
// kernel: tpu_custom_call.1
= control target key start
LH: loop header
LB: loop body
LE: loop exit
PB: predicated region body
PF: predicated region fallthrough
CT: control target
= control target key end

     0   :  { %10 = vsyncpa [#allocation5], 0  ;;  %s912_s0 = inlined_call_operand.hbm [shape: f32[2,2,2,256], index: 0, kind: input, shape index: {}]   ;;  %s913_s1 = inlined_call_operand.vmem [shape: f32[2,2,1], index: 1, kind: input, shape index: {}]   ;;  %s914_s2 = inlined_call_operand.vmem [shape: f32[2,2,1], index: 2, kind: input, shape index: {}]   ;;  %s915_s3 = inlined_call_operand.vmem [shape: f32[2,2,1], index: 3, kind: output, shape index: {0}]   ;;  %s916_s4 = inlined_call_operand.vmem [shape: f32[2,2,1], index: 4, kind: output, shape index: {1}]  }
   0x1   :  { %12 = vsyncpa [#allocation5 + $0x1], 0  ;;  %s751_s15 = smov 0   ;;  %s753_s16 = smov 0  }
   0x2   :  { %s755_s17 = smov 0   ;;  %s757_s18 = smov 0  }
   0x3   :  { %s759_s19 = smov 0   ;;  %s761_s20 = smov 0  }
   0x4 LB: > { %s557_s21 = sadd.s32 4294967295, %s719_s20   ;;  %s27_s22 = sadd.s32 1, %s715_s19  ;;  %s719_s20 = sphi %s761_s20, %s18_s20   ;;  %s715_s19 = sphi %s759_s19, %s924_s19   ;;  %s711_s18 = sphi %s757_s18, %s923_s18   ;;  %s707_s17 = sphi %s755_s17, %s922_s17   ;;  %s703_s16 = sphi %s753_s16, %s921_s16   ;;  %s699_s15 = sphi %s751_s15, %s920_s15  }
   0x5   : > { %p28_p0 = scmp.ge.s32.totalorder %s27_s22, 2  ;;  %s39_s23 = sadd.s32 1, %s707_s17 }
   0x6   : > { %p46_p1 = scmp.ne.s32.totalorder %s707_s17, %s703_s16  ;;  %p47_p2 = scmp.eq.s32.totalorder %s719_s20, 0 }
   0x7   : > { %s926_s22 = smov (%p28_p0, %s27_s22), 0  ;;  %p52_p4 = scmp.ne.s32.totalorder %s703_s16, %s699_s15 }
   0x8   : > { %p787_p3 = por %p47_p2, %p46_p1  ;;  %s34_s25 = ssub.s32 %s715_s19, %s926_s22 }
   0x9   : > { %p53_p5 = scmp.eq.s32.totalorder %s557_s21, 0  ;;  %p37_p6 = scmp.eq.s32.totalorder %s34_s25, 0 }
   0xa   : > { %p582_p8 = scmp.lt.s32.totalorder %s719_s20, 2  ;;  %s198_s28 = sand.u32 1, %s707_s17  }
   0xb   : > { %p794_p7 = por %p53_p5, %p52_p4  ;;  %s575_s29 = sshll.u32 %s715_s19, 7 }
   0xc   : > { %s800_s27 = scalar_select %p37_p6, %s707_s17, %s39_s23  }
   0xd   : > { %s562_s30 = sshll.u32 %s198_s28, 3  ;;  %s807_s7 = scalar_lea.hbm %s912_s0, %s575_s29 }
   0xe   : > { %s202_s8 = scalar_lea.vmem [#allocation4], %s562_s30  ;;  %p811_p9 = pnand %p582_p8, %p787_p3 }
   0xf   : > { %s212_s9 = sshll.u32 %s202_s8, 4  ;;  %s817_s11 = scalar_lea.sflag [#allocation5], %s198_s28  ;;  %s815_s9 = int_to_ptr.vmem [resolvable:$true] %s212_s9 }
  0x10   : > { %s639_s12 = scalar_lea.hbm %s807_s7, 128  ;;  %p641_p11 = pneg %p811_p9 }
  0x11   : > { %p640_p10 = scmp.ne.s32.totalorder %s807_s7, %s639_s12  ;;  %s644_s15 = scalar_lea.hbm %s912_s0, 256 }
  0x12   : > { %p645_p0 = scmp.lt.u32.totalorder %s807_s7, %s912_s0  ;;  %p646_p1 = scmp.lt.u32.totalorder %s644_s15, %s639_s12 }
  0x13   : > { %p642_p12 = pnand %p641_p11, %p640_p10  ;;  %p648_p3 = scmp.lt.u32.totalorder %s639_s12, %s807_s7 }
  0x14   : > { %p647_p2 = por %p646_p1, %p645_p0 }
  0x15   : > { %p643_p13 = pneg %p642_p12 }
  0x16   : > { %p649_p4 = por %p648_p3, %p647_p2 }
  0x18   : > { %p650_p5 = pnand %p649_p4, %p643_p13 }
  0x1a   : > { %653 = shalt.err (!%p650_p5)
}
  0x1b   : > { %s654_s24 = scalar_lea.vmem %s815_s9, 128  ;;  %s721_s25 = smov [#allocation4]  }
  0x1c   : > { %p655_p6 = scmp.ne.s32.totalorder %s815_s9, %s654_s24  ;;  %s659_s28 = sshll.u32 %s721_s25, 4  ;;  %s660_s28 = int_to_ptr.vmem [resolvable:$false] %s659_s28 }
  0x1d   : > { %s661_s29 = scalar_lea.vmem %s660_s28, 256  ;;  %p662_p12 = scmp.lt.s32.totalorder %s815_s9, %s660_s28 }
  0x1e   : > { %p657_p8 = pnand %p655_p6, %p641_p11  ;;  %p663_p0 = scmp.lt.s32.totalorder %s661_s29, %s654_s24 }
  0x20   : > { %p658_p10 = pneg %p657_p8  ;;  %p664_p1 = por %p663_p0, %p662_p12 }
  0x22   : > { %p665_p2 = pnand %p664_p1, %p658_p10 }
  0x24   : > { %668 = shalt.err (!%p665_p2)
}
  0x25   : > { %s722_s30 = smov 64   ;;  %s723_s5 = smov 4  }
  0x26   : > { %581 = dma.hbm_to_vmem [thread:$0]  (!%p811_p9), %s807_s7, 128, %s815_s9, %s817_s11, %s722_s30, %s722_s30, %s723_s5  }
  0x27   : > { %p565_p11 = scmp.ge.s32.totalorder %s719_s20, 1  ;;  %p220_p13 = scmp.lt.s32.totalorder %s719_s20, 3 }
  0x29   : > { %p221_p3 = pnand %p565_p11, %p220_p13 }
  0x2a   : > { %s226_s6 = sand.u32 (!%p221_p3), 1, %s703_s16  }
  0x2b   : > { %224 = sbr.rel (%p221_p3) target bundleno = 256 (0x100), region = 32  ;;  %s566_s8 = sshll.u32 (!%p221_p3), %s226_s6, 3 }
  0x2c   : > { %s227_s12 = scalar_lea.sflag (!%p221_p3), [#allocation5], %s226_s6  ;;  %s230_s13 = scalar_lea.vmem (!%p221_p3), [#allocation4], %s566_s8 }
  0x32   : > { %694 = dma.done.wait (%p794_p7), %s227_s12, 128  }
  0x33   : > { %696 = vsyncadd (%p794_p7), %s227_s12, 4294967168  ;;  %p567_p4 = scmp.ne.s32.totalorder %s711_s18, 0 }
  0x34   : > { %vm299_vm0 = vcmask (!%p567_p4), 1024   ;;  %v724_v0 = vmov (!%p567_p4), 0.0  }
  0x35   : > { %298 = sbr.rel (%p567_p4) target bundleno = 60 (0x3c), region = 40  ;;  %300 = vst.msk [vmem:[#allocation2] sm:$0x3] (!%p567_p4), %vm299_vm0, %v724_v0  ;;  %301 = vst.msk [vmem:[#allocation2 + $0x2] sm:$0x3] (!%p567_p4), %vm299_vm0, %v724_v0 }
  0x36   : > { %302 = vst.msk [vmem:[#allocation3] sm:$0x3] (!%p567_p4), %vm299_vm0, %v724_v0  ;;  %303 = vst.msk [vmem:[#allocation3 + $0x2] sm:$0x3] (!%p567_p4), %vm299_vm0, %v724_v0 }
  0x3c PF: > { %v304_v1 = vld [vmem:[%s230_s13] sm:$0xf]  ;;  %v313_v2 = vlaneseq  ;;  %v725_v3 = vmov 1983009808   ;;  %v305_v5 = vld [vmem:[%s230_s13 + $0x4] sm:$0xf] }
  0x3d   : > { %v311_v4 = vunpack.c.l.s4 %v725_v3  ;;  %v348_v8 = vmul.f32 %v304_v1, %v304_v1  ;;  %v349_v9 = vmul.f32 %v305_v5, %v305_v5  ;;  %vm330_vm1 = vcmask 1041408   ;;  %v346_v31 = vld [vmem:[#allocation3] sm:$0x3]  ;;  %v306_v32 = vld [vmem:[#allocation2] sm:$0x3]  ;;  %p568_p7 = scmp.ne.s32.totalorder %s711_s18, 1 }
  0x3e   : > { %v314_v6 = vshrl.u32 %v313_v2, 7  ;;  %vm343_vm2 = vcmask 1024   ;;  %v347_v37 = vld [vmem:[#allocation3 + $0x2] sm:$0x3]  ;;  %v307_v38 = vld [vmem:[#allocation2 + $0x2] sm:$0x3] }
  0x3f   : > { %v312_v7 = vunpack.c.0.s8 %v311_v4  ;;  %v402_v57 = vld [vmem:[%s913_s1] sm:$0x3] (!%p568_p7)  ;;  %v403_v58 = vld [vmem:[%s913_s1 + $0x2] sm:$0x3] (!%p568_p7) }
  0x40   : > { %v412_v63 = vld [vmem:[%s914_s2] sm:$0x3] (!%p568_p7) }
  0x41   : > { %v315_v10 = vsub.s32 %v312_v7, %v314_v6 }
  0x43   : > { %v358_v11 = vrot.slane %v348_v8, %v315_v10  ;;  %v316_v12 = vrot.slane %v304_v1, %v315_v10  ;;  %v366_v13 = vrot.slane %v349_v9, %v315_v10  ;;  %v324_v14 = vrot.slane %v305_v5, %v315_v10  ;;  %v413_v1 = vld [vmem:[%s914_s2 + $0x2] sm:$0x3] (!%p568_p7) }
  0x45   : > { %v359_v15 = vcombine.high %v358_v11, %v358_v11  ;;  %v372_v16 = vsel %vm330_vm1, %v358_v11, 0.0  ;;  %v317_v17 = vcombine.high %v316_v12, %v316_v12  ;;  %v331_v18 = vsel %vm330_vm1, %v316_v12, 0.0 }
  0x46   : > { %v367_v19 = vcombine.high %v366_v13, %v366_v13  ;;  %v325_v20 = vcombine.high %v324_v14, %v324_v14  ;;  %v377_v23 = vsel %vm330_vm1, %v366_v13, 0.0  ;;  %v336_v24 = vsel %vm330_vm1, %v324_v14, 0.0 }
  0x47   : > { %v373_v21 = vsel %vm330_vm1, %v359_v15, 0.0  ;;  %v332_v22 = vsel %vm330_vm1, %v317_v17, 0.0 }
  0x48   : > { %v374_v25 = vadd.f32 %v373_v21, %v372_v16  ;;  %v333_v26 = vadd.f32 %v332_v22, %v331_v18  ;;  %v378_v27 = vsel %vm330_vm1, %v367_v19, 0.0  ;;  %v337_v28 = vsel %vm330_vm1, %v325_v20, 0.0 }
  0x49   : > { %v379_v29 = vadd.f32 %v378_v27, %v377_v23  ;;  %v338_v30 = vadd.f32 %v337_v28, %v336_v24 }
  0x4a   : > { %375 = vadd.xlane.f32.xlu1 %v374_v25  ;;  %334 = vadd.xlane.f32.xlu0 %v333_v26 }
  0x4e   : > { %380 = vadd.xlane.f32.xlu1 %v379_v29  ;;  %339 = vadd.xlane.f32.xlu0 %v338_v30 }
  0xd7   : > { %v376_v33 = vpop.xlane.xlu1 %375  ;;  %v335_v34 = vpop.xlane.xlu0 %334 }
  0xd8   : > { %v382_v35 = vadd.f32 %v376_v33, %v346_v31  ;;  %v341_v36 = vadd.f32 %v335_v34, %v306_v32  ;;  %389 = sbr.rel (%p568_p7) target bundleno = 256 (0x100), region = 44 }
  0xda   : > { %384 = vst.msk [vmem:[#allocation3] sm:$0x3] %vm343_vm2, %v382_v35  ;;  %344 = vst.msk [vmem:[#allocation2] sm:$0x3] %vm343_vm2, %v341_v36 }
  0xdb   : > { %v381_v39 = vpop.xlane.xlu1 %380  ;;  %v340_v40 = vpop.xlane.xlu0 %339 }
  0xdc   : > { %v383_v41 = vadd.f32 %v381_v39, %v347_v37  ;;  %v342_v42 = vadd.f32 %v340_v40, %v307_v38 }
  0xde   : > { %385 = vst.msk [vmem:[#allocation3 + $0x2] sm:$0x3] %vm343_vm2, %v383_v41  ;;  %345 = vst.msk [vmem:[#allocation2 + $0x2] sm:$0x3] %vm343_vm2, %v342_v42 }
  0xe1   : > { %v390_v43 = vld [vmem:[#allocation2] sm:$0x3]  ;;  %v394_v44 = vld [vmem:[#allocation3] sm:$0x3] }
  0xe2   : > { %v392_v45 = vmul.f32 0.001953125, %v390_v43  ;;  %v396_v46 = vmul.f32 0.001953125, %v394_v44 }
  0xe4   : > { %v398_v51 = vmul.f32 %v392_v45, %v392_v45 }
  0xe5   : > { %v391_v47 = vld [vmem:[#allocation2 + $0x2] sm:$0x3]  ;;  %v395_v48 = vld [vmem:[#allocation3 + $0x2] sm:$0x3] }
  0xe6   : > { %v393_v49 = vmul.f32 0.001953125, %v391_v47  ;;  %v397_v50 = vmul.f32 0.001953125, %v395_v48  ;;  %v400_v53 = vsub.f32 %v396_v46, %v398_v51 }
  0xe8   : > { %v399_v52 = vmul.f32 %v393_v49, %v393_v49  ;;  %v404_v55 = vadd.f32 1e-05, %v400_v53 }
  0xea   : > { %v401_v54 = vsub.f32 %v397_v50, %v399_v52  ;;  %635 = vrsqrt.f32 %v404_v55 }
  0xec   : > { %v405_v56 = vadd.f32 1e-05, %v401_v54 }
  0xee   : > { %637 = vrsqrt.f32 %v405_v56 }
  0xf4   : > { %v636_v59 = vpop.eup %635 }
  0xf5   : > { %v408_v61 = vmul.f32 %v636_v59, %v402_v57 }
  0xf7   : > { %410 = vst.msk [vmem:[%s915_s3] sm:$0x3] %vm343_vm2, %v408_v61  ;;  %v414_v0 = vmul.f32 %v408_v61, %v392_v45 }
  0xf8   : > { %v638_v60 = vpop.eup %637 }
  0xf9   : > { %v409_v62 = vmul.f32 %v638_v60, %v403_v58  ;;  %v416_v3 = vsub.f32 %v412_v63, %v414_v0 }
  0xfb   : > { %411 = vst.msk [vmem:[%s915_s3 + $0x2] sm:$0x3] %vm343_vm2, %v409_v62  ;;  %v415_v2 = vmul.f32 %v409_v62, %v393_v49  ;;  %418 = vst.msk [vmem:[%s916_s4] sm:$0x3] %vm343_vm2, %v416_v3 }
  0xfd   : > { %v417_v4 = vsub.f32 %v413_v1, %v415_v2 }
  0xff   : > { %419 = vst.msk [vmem:[%s916_s4 + $0x2] sm:$0x3] %vm343_vm2, %v417_v4 }
 0x100 PF: > { %s18_s20 = sadd.s32 1, %s719_s20   ;;  %s920_s15 = smov %s703_s16 }
 0x101   : > { %p15_p9 = scmp.ge.s32.totalorder %s18_s20, 4   ;;  %s921_s16 = smov %s707_s17 }
 0x102   : > { %s922_s17 = smov %s800_s27  ;;  %s923_s18 = smov %s715_s19 }
 0x103   : > { %s924_s19 = smov %s926_s22  ;;  %17 = sbr.rel (!%p15_p9) target bundleno = 4 (0x4), region = 98 }
 0x10a   :  { %459 = vsyncpa [#allocation5], 1 }
 0x10b   :  { %461 = vsyncpa [#allocation5 + $0x1], 1 }

</bundles_post_ra>
